<compile_context>
chip_gen: v6e
topology: v6e:2x2x1
jax: 0.10.0
libtpu: 0.0.40
codegen_flags: <defaults>
</compile_context>

<pallas_src>
import math

import jax
import jax.numpy as jnp
from jax.experimental import pallas as pl
from jax.experimental.pallas import tpu as pltpu

EPS = 1e-07


def _round_up(x, m):
    return ((x + m - 1) // m) * m


def _cdiv(a, b):
    return (a + b - 1) // b


def _device_kind():
    try:
        return jax.devices()[0].device_kind.lower()
    except Exception:
        return ""


def _is_v7x():
    kind = _device_kind()
    return ("v7" in kind) or ("7x" in kind)


def _default_n_split():
    # Two TensorCores / HBM paths only on v7x; v5e/v6e have a single TC.
    return 2 if _is_v7x() else 1


def _default_vmem_limit():
    # v7x: 64 MiB VMEM per TensorCore -> stay well under. v5e/v6e: 128 MiB.
    return (48 if _is_v7x() else 96) * 1024 * 1024


def _f1_sums_kernel(yp_ref, yt_ref, acc_ref):
    """Accumulate per-lane tp / sum(y_pred) / sum(y_true) partials."""
    i = pl.program_id(1)

    @pl.when(i == 0)
    def _init():
        acc_ref[...] = jnp.zeros_like(acc_ref)

    yp = yp_ref[...].astype(jnp.float32)
    yt = yt_ref[...].astype(jnp.float32)
    rows, lanes = yp.shape                     # static block shape
    yp3 = yp.reshape(rows // 8, 8, lanes)      # aligned to native (8,128) tiling
    yt3 = yt.reshape(rows // 8, 8, lanes)

    # Leading-axis sums are vreg-to-vreg VPU adds (no per-step XLU reduce).
    acc_ref[0] += jnp.sum(yt3 * yp3, axis=0)   # tp partial           (8, lanes)
    acc_ref[1] += jnp.sum(yp3, axis=0)         # sum(y_pred) partial  (8, lanes)
    acc_ref[2] += jnp.sum(yt3, axis=0)         # sum(y_true) partial  (8, lanes)


def f1_loss(y_pred, y_true, *, epsilon=EPS, batch_tile=8192, n_split=None,
            vmem_limit_bytes=None, cast_true_to_bf16=True, n_buffers=3):
    assert y_pred.shape == y_true.shape and y_pred.ndim == 2
    n, c = y_pred.shape

    if n_split is None:
        n_split = _default_n_split()
    if vmem_limit_bytes is None:
        vmem_limit_bytes = _default_vmem_limit()

    # --- cut HBM bytes: {0,1} multi-label targets are exact in bf16 ---------
    # (Set cast_true_to_bf16=False for soft / non-binary targets.)
    if cast_true_to_bf16 and y_true.dtype == jnp.float32:
        y_true = y_true.astype(jnp.bfloat16)

    # --- lane folding: make the lane dim a multiple of 128 whenever cheap ---
    g = math.gcd(c, 128)
    k = 128 // g if (c % 128 != 0) else 1
    if k * c > 8192:               # don't fold very wide class dims (VMEM blowup)
        k = 1
    lanes = k * c

    itemsize = int(y_pred.dtype.itemsize) + int(y_true.dtype.itemsize)

    # --- batch tile (folded rows), capped by the double/triple-buffer budget -
    r_raw = _cdiv(n, k)
    r16 = _round_up(r_raw, 16)                     # 16-row multiple (bf16 safe)
    budget = vmem_limit_bytes // 2                 # headroom for temps + acc
    per_row = max(1, n_buffers * lanes * itemsize)
    max_tile = max(16, (budget // per_row) // 16 * 16)
    tile = min(_round_up(batch_tile, 16), r16, max_tile)

    steps = _cdiv(r16, tile)
    n_split = max(1, min(n_split, steps))          # cross-TensorCore split (v7x)
    steps_total = _round_up(steps, n_split)
    if steps_total != steps:
        # Shrink the tile instead of streaming whole tiles of zeros.
        tile = _round_up(_cdiv(r16, steps_total), 16)
    r_pad = steps_total * tile
    inner = steps_total // n_split

    # --- single merged zero-pad (zero rows contribute nothing to the sums) --
    n_pad = r_pad * k
    if n_pad != n:
        y_pred = jnp.pad(y_pred, ((0, n_pad - n), (0, 0)))
        y_true = jnp.pad(y_true, ((0, n_pad - n), (0, 0)))
    y_pred = y_pred.reshape(r_pad, lanes)
    y_true = y_true.reshape(r_pad, lanes)

    idx_map = lambda p, i: (p * inner + i, 0)
    if n_buffers > 2 and inner >= n_buffers:
        in_spec = pl.BlockSpec((tile, lanes), idx_map,
                               pipeline_mode=pl.Buffered(n_buffers))
    else:
        in_spec = pl.BlockSpec((tile, lanes), idx_map)
    out_spec = pl.BlockSpec((3, 8, lanes), lambda p, i: (p, 0, 0))

    bytes_accessed = (y_pred.size * int(y_pred.dtype.itemsize)
                      + y_true.size * int(y_true.dtype.itemsize)
                      + n_split * 3 * 8 * lanes * 4)

    acc = pl.pallas_call(
        _f1_sums_kernel,
        out_shape=jax.ShapeDtypeStruct((n_split * 3, 8, lanes), jnp.float32),
        grid_spec=pltpu.PrefetchScalarGridSpec(
            num_scalar_prefetch=0,
            grid=(n_split, inner),
            in_specs=[in_spec, in_spec],
            out_specs=out_spec,
        ),
        compiler_params=pltpu.CompilerParams(
            dimension_semantics=("parallel", "arbitrary"),
            vmem_limit_bytes=vmem_limit_bytes,
        ),
        cost_estimate=pl.CostEstimate(
            flops=int(4 * r_pad * lanes),
            transcendentals=0,
            bytes_accessed=int(bytes_accessed),
        ),
    )(y_pred, y_true)

    # --- tiny O(C) epilogue: fold partials, derive fp/fn, compute the loss ---
    sums = acc.reshape(n_split, 3, 8, k, c).sum(axis=(0, 2, 3))  # (3, C)
    tp, s_pred, s_true = sums[0], sums[1], sums[2]
    fp = s_pred - tp
    fn = s_true - tp
    precision = tp / (tp + fp + epsilon)
    recall = tp / (tp + fn + epsilon)
    f1 = 2.0 * precision * recall / (precision + recall + epsilon)
    f1 = jnp.clip(f1, epsilon, 1.0 - epsilon)
    return 1.0 - jnp.mean(f1)


def _f1_loss_ref(y_pred, y_true, epsilon=EPS):
    yp = y_pred.astype(jnp.float32)
    yt = y_true.astype(jnp.float32)
    tp = jnp.sum(yt * yp, axis=0)
    fp = jnp.sum((1.0 - yt) * yp, axis=0)
    fn = jnp.sum(yt * (1.0 - yp), axis=0)
    p = tp / (tp + fp + epsilon)
    r = tp / (tp + fn + epsilon)
    f1 = 2.0 * (p * r) / (p + r + epsilon)
    f1 = jnp.clip(f1, epsilon, 1.0 - epsilon)
    return 1.0 - jnp.mean(f1)


if __name__ == "__main__":
    key = jax.random.PRNGKey(0)
    k1, k2 = jax.random.split(key)

    N, C = 64, 32  # batch x num_classes (multi-label)
    y_pred = jax.nn.sigmoid(jax.random.normal(k1, (N, C), dtype=jnp.float32))
    y_true = (jax.random.uniform(k2, (N, C)) > 0.5).astype(jnp.float32)

    loss = f1_loss(y_pred, y_true)
    loss = jax.block_until_ready(loss)

    ref = _f1_loss_ref(y_pred, y_true)
    assert jnp.allclose(loss, ref, atol=1e-5, rtol=1e-5), (loss, ref)

    print("KERNEL_OK")
</pallas_src>

<mosaic_0001>
module attributes {stable_mosaic.version = 11 : i64} {
  func.func @_f1_sums_kernel(%arg0: i32, %arg1: i32, %arg2: memref<16x128xf32, #tpu.memory_space<vmem>>, %arg3: memref<16x128xbf16, #tpu.memory_space<vmem>>, %arg4: memref<3x8x128xf32, #tpu.memory_space<vmem>>) attributes {dimension_semantics = [#tpu.dimension_semantics<parallel>, #tpu.dimension_semantics<arbitrary>], iteration_bounds = array<i64: 1, 1>, scalar_prefetch = 0 : i64, scratch_operands = 0 : i64, tpu.core_type = #tpu.core_type<tc>, window_params = [{transform_indices = @transform_0, window_bounds = array<i64: 16, 128>}, {transform_indices = @transform_1, window_bounds = array<i64: 16, 128>}, {transform_indices = @transform_2, window_bounds = array<i64: 3, 8, 128>}]} {
    %c0_i32 = arith.constant 0 : i32
    %0 = arith.cmpi eq, %arg1, %c0_i32 : i32
    %1 = arith.extui %0 : i1 to i32
    %c0_i32_0 = arith.constant 0 : i32
    %2 = arith.cmpi ne, %1, %c0_i32_0 : i32
    scf.if %2 {
      %cst_22 = arith.constant 0.000000e+00 : f32
      %30 = vector.broadcast %cst_22 : f32 to vector<3x8x128xf32>
      %c0_23 = arith.constant 0 : index
      %c0_24 = arith.constant 0 : index
      %c0_25 = arith.constant 0 : index
      %31 = vector.load %arg4[%c0_23, %c0_24, %c0_25] : memref<3x8x128xf32, #tpu.memory_space<vmem>>, vector<3x8x128xf32>
      tpu.vector_store %arg4[%c0_23, %c0_24, %c0_25], %30 {strides = array<i32>} : memref<3x8x128xf32, #tpu.memory_space<vmem>>, vector<3x8x128xf32>,
    } else {
    }
    %c0 = arith.constant 0 : index
    %c0_1 = arith.constant 0 : index
    %3 = vector.load %arg2[%c0, %c0_1] : memref<16x128xf32, #tpu.memory_space<vmem>>, vector<16x128xf32>
    %c0_2 = arith.constant 0 : index
    %c0_3 = arith.constant 0 : index
    %4 = vector.load %arg3[%c0_2, %c0_3] : memref<16x128xbf16, #tpu.memory_space<vmem>>, vector<16x128xbf16>
    %5 = arith.extf %4 : vector<16x128xbf16> to vector<16x128xf32>
    %6 = vector.shape_cast %3 : vector<16x128xf32> to vector<2x8x128xf32>
    %7 = vector.shape_cast %5 : vector<16x128xf32> to vector<2x8x128xf32>
    %c0_4 = arith.constant 0 : index
    %c0_5 = arith.constant 0 : index
    %c0_6 = arith.constant 0 : index
    %8 = vector.load %arg4[%c0_4, %c0_5, %c0_6] : memref<3x8x128xf32, #tpu.memory_space<vmem>>, vector<1x8x128xf32>
    %9 = vector.shape_cast %8 : vector<1x8x128xf32> to vector<8x128xf32>
    %10 = arith.mulf %7, %6 : vector<2x8x128xf32>
    %cst = arith.constant dense<0.000000e+00> : vector<8x128xf32>
    %11 = vector.multi_reduction <add>, %10, %cst [0] : vector<2x8x128xf32> to vector<8x128xf32>
    %12 = arith.addf %9, %11 : vector<8x128xf32>
    %c0_7 = arith.constant 0 : index
    %c0_8 = arith.constant 0 : index
    %c0_9 = arith.constant 0 : index
    %13 = vector.load %arg4[%c0_7, %c0_8, %c0_9] : memref<3x8x128xf32, #tpu.memory_space<vmem>>, vector<1x8x128xf32>
    %14 = vector.shape_cast %13 : vector<1x8x128xf32> to vector<8x128xf32>
    %15 = vector.shape_cast %12 : vector<8x128xf32> to vector<1x8x128xf32>
    tpu.vector_store %arg4[%c0_7, %c0_8, %c0_9], %15 {strides = array<i32>} : memref<3x8x128xf32, #tpu.memory_space<vmem>>, vector<1x8x128xf32>,
    %c1 = arith.constant 1 : index
    %c0_10 = arith.constant 0 : index
    %c0_11 = arith.constant 0 : index
    %16 = vector.load %arg4[%c1, %c0_10, %c0_11] : memref<3x8x128xf32, #tpu.memory_space<vmem>>, vector<1x8x128xf32>
    %17 = vector.shape_cast %16 : vector<1x8x128xf32> to vector<8x128xf32>
    %cst_12 = arith.constant dense<0.000000e+00> : vector<8x128xf32>
    %18 = vector.multi_reduction <add>, %6, %cst_12 [0] : vector<2x8x128xf32> to vector<8x128xf32>
    %19 = arith.addf %17, %18 : vector<8x128xf32>
    %c1_13 = arith.constant 1 : index
    %c0_14 = arith.constant 0 : index
    %c0_15 = arith.constant 0 : index
    %20 = vector.load %arg4[%c1_13, %c0_14, %c0_15] : memref<3x8x128xf32, #tpu.memory_space<vmem>>, vector<1x8x128xf32>
    %21 = vector.shape_cast %20 : vector<1x8x128xf32> to vector<8x128xf32>
    %22 = vector.shape_cast %19 : vector<8x128xf32> to vector<1x8x128xf32>
    tpu.vector_store %arg4[%c1_13, %c0_14, %c0_15], %22 {strides = array<i32>} : memref<3x8x128xf32, #tpu.memory_space<vmem>>, vector<1x8x128xf32>,
    %c2 = arith.constant 2 : index
    %c0_16 = arith.constant 0 : index
    %c0_17 = arith.constant 0 : index
    %23 = vector.load %arg4[%c2, %c0_16, %c0_17] : memref<3x8x128xf32, #tpu.memory_space<vmem>>, vector<1x8x128xf32>
    %24 = vector.shape_cast %23 : vector<1x8x128xf32> to vector<8x128xf32>
    %cst_18 = arith.constant dense<0.000000e+00> : vector<8x128xf32>
    %25 = vector.multi_reduction <add>, %7, %cst_18 [0] : vector<2x8x128xf32> to vector<8x128xf32>
    %26 = arith.addf %24, %25 : vector<8x128xf32>
    %c2_19 = arith.constant 2 : index
    %c0_20 = arith.constant 0 : index
    %c0_21 = arith.constant 0 : index
    %27 = vector.load %arg4[%c2_19, %c0_20, %c0_21] : memref<3x8x128xf32, #tpu.memory_space<vmem>>, vector<1x8x128xf32>
    %28 = vector.shape_cast %27 : vector<1x8x128xf32> to vector<8x128xf32>
    %29 = vector.shape_cast %26 : vector<8x128xf32> to vector<1x8x128xf32>
    tpu.vector_store %arg4[%c2_19, %c0_20, %c0_21], %29 {strides = array<i32>} : memref<3x8x128xf32, #tpu.memory_space<vmem>>, vector<1x8x128xf32>,
    return
  }
  func.func @transform_0(%arg0: i32, %arg1: i32) -> (i32, i32) {
    %c1_i32 = arith.constant 1 : i32
    %0 = arith.muli %arg0, %c1_i32 : i32
    %1 = arith.addi %0, %arg1 : i32
    %c0_i32 = arith.constant 0 : i32
    %c0_i32_0 = arith.constant 0 : i32
    return %1, %c0_i32 : i32, i32
  }
  func.func @transform_1(%arg0: i32, %arg1: i32) -> (i32, i32) {
    %c1_i32 = arith.constant 1 : i32
    %0 = arith.muli %arg0, %c1_i32 : i32
    %1 = arith.addi %0, %arg1 : i32
    %c0_i32 = arith.constant 0 : i32
    %c0_i32_0 = arith.constant 0 : i32
    return %1, %c0_i32 : i32, i32
  }
  func.func @transform_2(%arg0: i32, %arg1: i32) -> (i32, i32, i32) {
    %c0_i32 = arith.constant 0 : i32
    %c0_i32_0 = arith.constant 0 : i32
    %c0_i32_1 = arith.constant 0 : i32
    return %arg0, %c0_i32, %c0_i32_0 : i32, i32, i32
  }
}

</mosaic_0001>

<bundles_post_ra>
// kernel: tpu_custom_call.1
= control target key start
LH: loop header
LB: loop body
LE: loop exit
PB: predicated region body
PF: predicated region fallthrough
CT: control target
= control target key end

     0   :  { %7 = vsyncpa [#allocation3], 0  ;;  %s214_s0 = inlined_call_operand.hbm [shape: f32[16,128], index: 0, kind: input, shape index: {}]   ;;  %s215_s1 = inlined_call_operand.hbm [shape: bf16[16,128], index: 1, kind: input, shape index: {}]   ;;  %s216_s2 = inlined_call_operand.hbm [shape: f32[3,8,128], index: 2, kind: output, shape index: {}]  }
   0x1   :  { %8 = vsyncpa [#allocation6], 0 }
   0x2   :  { %9 = vsyncpa [#allocation4], 0  ;;  %s177_s9 = smov [#allocation2]  }
   0x3   :  { %s19_s10 = sshll.u32 %s177_s9, 4  ;;  %s20_s10 = int_to_ptr.vmem [resolvable:$true] %s19_s10 }
   0x4   :  { %s119_s11 = scalar_lea.vmem %s20_s10, 256  ;;  %p124_p1 = scmp.lt.s32.totalorder %s20_s10, %s20_s10 }
   0x5   :  { %p120_p0 = scmp.ne.s32.totalorder %s20_s10, %s119_s11  ;;  %p125_p2 = scmp.lt.s32.totalorder %s119_s11, %s119_s11 }
   0x7   :  { %p126_p3 = por %p125_p2, %p124_p1 }
   0x9   :  { %p127_p4 = pnand %p126_p3, %p120_p0 }
   0xb   :  { %130 = shalt.err (!%p127_p4)
}
   0xc   :  { %s178_s12 = smov 128   ;;  %s179_s13 = smov 8  }
   0xd   :  { %25 = dma.hbm_to_vmem [thread:$0]  %s214_s0, 256, %s20_s10, [#allocation3], %s178_s12, %s178_s12, %s179_s13  }
   0xe   :  { %s180_s16 = smov [#allocation5]  }
   0xf   :  { %s35_s17 = sshll.u32 %s180_s16, 4  ;;  %s36_s17 = int_to_ptr.vmem [resolvable:$true] %s35_s17 }
  0x10   :  { %s139_s18 = scalar_lea.vmem %s36_s17, 128  ;;  %p144_p6 = scmp.lt.s32.totalorder %s36_s17, %s36_s17 }
  0x11   :  { %p140_p5 = scmp.ne.s32.totalorder %s36_s17, %s139_s18  ;;  %p145_p7 = scmp.lt.s32.totalorder %s139_s18, %s139_s18 }
  0x13   :  { %p146_p8 = por %p145_p7, %p144_p6 }
  0x15   :  { %p147_p9 = pnand %p146_p8, %p140_p5 }
  0x17   :  { %150 = shalt.err (!%p147_p9)
}
  0x18   :  { %s181_s19 = smov 64   ;;  %s182_s20 = smov 4  }
  0x19   :  { %41 = dma.hbm_to_vmem [thread:$0]  %s215_s1, 128, %s36_s17, [#allocation6], %s181_s19, %s181_s19, %s182_s20  }
  0x1a   :  { %171 = dma.done.wait [#allocation3], 256  }
  0x1b   :  { %172 = vsyncadd [#allocation3], 4294967040 }
  0x1c   :  { %173 = dma.done.wait [#allocation6], 128  }
  0x1d   :  { %174 = vsyncadd [#allocation6], 4294967168  ;;  %v59_v0 = vld [vmem:[#allocation2] sm:$0xff]  ;;  %v60_v1 = vld [vmem:[#allocation2 + $0x8] sm:$0xff]  ;;  %s183_s0 = smov [#allocation7]  }
  0x1e   :  { %v100_v2 = vld [vmem:[#allocation5] sm:$0xff]   ;;  %v73_v5 = vadd.f32 %v60_v1, %v59_v0  ;;  %s86_s23 = sshll.u32 %s183_s0, 4  ;;  %s87_s23 = int_to_ptr.vmem [resolvable:$true] %s86_s23 }
  0x1f   :  { %v101_v3 = vunpack.c.l.bf16 %v100_v2  ;;  %v102_v4 = vunpack.c.h.bf16 %v100_v2  ;;  %s151_s1 = scalar_lea.vmem %s87_s23, 384  ;;  %p156_p11 = scmp.lt.s32.totalorder %s87_s23, %s87_s23 }
  0x20   :  { %75 = vst [vmem:[#allocation7 + $0x8] sm:$0xff] %v73_v5  ;;  %p152_p10 = scmp.ne.s32.totalorder %s87_s23, %s151_s1  ;;  %p157_p12 = scmp.lt.s32.totalorder %s151_s1, %s151_s1 }
  0x21   :  { %v66_v6 = vmul.f32 %v101_v3, %v59_v0  ;;  %v67_v7 = vmul.f32 %v102_v4, %v60_v1  ;;  %v78_v8 = vadd.f32 %v102_v4, %v101_v3 }
  0x22   :  { %p158_p13 = por %p157_p12, %p156_p11 }
  0x23   :  { %v68_v9 = vadd.f32 %v67_v7, %v66_v6  ;;  %80 = vst [vmem:[#allocation7 + $0x10] sm:$0xff] %v78_v8 }
  0x24   :  { %p159_p0 = pnand %p158_p13, %p152_p10 }
  0x25   :  { %70 = vst [vmem:[#allocation7] sm:$0xff] %v68_v9 }
  0x26   :  { %162 = shalt.err (!%p159_p0)
}
  0x27   :  { %92 = dma.vmem_to_hbm [thread:$0]  %s87_s23, 384, %s216_s2, [#allocation4], %s178_s12, %s178_s12, %s179_s13  }
  0x28   :  { %175 = dma.done.wait [#allocation4], 384  }
  0x29   :  { %176 = vsyncadd [#allocation4], 4294966912 }
  0x2a   :  { %96 = vsyncpa [#allocation3], 1 }
  0x2b   :  { %97 = vsyncpa [#allocation6], 1 }
  0x2c   :  { %98 = vsyncpa [#allocation4], 1 }

</bundles_post_ra>
